<compile_context>
chip_gen: v7x
topology: tpu7x:2x2x1
jax: 0.10.0
libtpu: 0.0.40
codegen_flags: <defaults>
</compile_context>

<pallas_src>
import jax
import jax.numpy as jnp
from jax.experimental import pallas as pl
from jax.experimental.pallas import tpu as pltpu


def _round_up(x, m):
    return ((x + m - 1) // m) * m


def _vmem_budget_bytes():
    """Per-generation VMEM budget: ~75% of physical, capped at 100 MiB.
    v5e/v6e (128 MiB) -> 96-100 MiB; v7x (64 MiB per TC) -> 48 MiB; fallback is v7x-safe."""
    cap = 64 << 20
    try:
        info = pltpu.get_tpu_info()
        cap = int(getattr(info, "vmem_capacity_bytes", cap))
    except Exception:
        pass
    return max(32 << 20, min((cap * 3) // 4, 100 << 20))


def _pick_tile(dim, cap, gran):
    """Smallest tile (multiple of `gran`, capped) that keeps the block count equal to
    cdiv(dim, cap) -> avoids the 2x padded-work blow-up for dims just above a multiple."""
    cap = max(gran, _round_up(cap, gran))
    if dim <= cap:
        return _round_up(dim, gran)
    nblk = -(-dim // cap)
    return min(cap, _round_up(-(-dim // nblk), gran))


def _choose_tiles(M, N, D, stream_bytes, operand_bytes, vmem_budget):
    """Lane-dense (x128) / sublane-aligned (x8) tiles, grown up to 1024 x 2048 and shrunk
    until the double-buffered working set fits the per-generation VMEM budget."""
    slack = 2 << 20

    def fits(tm, tn):
        need = 2 * (tm * tn * stream_bytes            # streamed target/mask/recon tiles
                    + (tm + tn) * D * operand_bytes   # A/B tiles
                    + 8 * tn * 4)                     # lane-dense loss partial block
        return need + slack <= vmem_budget

    tm = _pick_tile(M, 1024, 8)
    tn = _pick_tile(N, 2048, 128)
    while not fits(tm, tn):
        if tm > 256:
            tm = _round_up(tm // 2, 8)
        elif tn > 256:
            tn = _round_up(tn // 2, 128)
        elif tm > 8:
            tm = _round_up(tm // 2, 8)
        elif tn > 128:
            tn = _round_up(tn // 2, 128)
        else:
            break
    return tm, tn


def _edge_valid_mask(i, j, tm, tn, M, N, row_ragged, col_ragged):
    """Validity mask for ragged boundary tiles (None when the tile is fully in-bounds)."""
    valid = None
    if row_ragged:
        rows = jax.lax.broadcasted_iota(jnp.int32, (tm, tn), 0) + i * tm
        valid = rows < M
    if col_ragged:
        cols = jax.lax.broadcasted_iota(jnp.int32, (tm, tn), 1) + j * tn
        cvalid = cols < N
        valid = cvalid if valid is None else (valid & cvalid)
    return valid


# ---------------------------------------------------------------------------------------
# Loss-only kernel: R diagonal relations sharing the same (A, B) operands, stacked on a
# trailing grid axis.   loss = sum_r sum( (A @ diag(r_r) @ B^T - T_r)^2 )
# ---------------------------------------------------------------------------------------
def stacked_sse_loss(a, rel_stack, b, targets, *, compute_dtype=jnp.float32):
    R, M, N = targets.shape
    D = a.shape[1]
    cdt = jnp.dtype(compute_dtype)
    budget = _vmem_budget_bytes()
    t_bytes = targets.dtype.itemsize
    tm, tn = _choose_tiles(M, N, D, t_bytes, cdt.itemsize, budget)
    gm, gn = pl.cdiv(M, tm), pl.cdiv(N, tn)

    a_c = a.astype(compute_dtype)                                  # (M, D)
    b_c = b.astype(compute_dtype)                                  # (N, D)
    rel = rel_stack.astype(compute_dtype).reshape(R, 1, D)         # (R, 1, D)

    row_ragged = (M % tm) != 0
    col_ragged = (N % tn) != 0

    def kernel(rel_ref, a_ref, b_ref, t_ref, loss_ref):
        i, j, r = pl.program_id(0), pl.program_id(1), pl.program_id(2)

        @pl.when((j == 0) & (r == 0))
        def _():
            loss_ref[...] = jnp.zeros_like(loss_ref)

        ar = a_ref[...] * rel_ref[0]                               # (tm, D) VPU diag scale
        recon = jax.lax.dot_general(                               # (tm, tn) = (A*r) @ B^T
            ar, b_ref[...], (((1,), (1,)), ((), ())),
            preferred_element_type=jnp.float32)
        diff = recon - t_ref[0].astype(jnp.float32)
        sq = diff * diff
        valid = _edge_valid_mask(i, j, tm, tn, M, N, row_ragged, col_ragged)
        if valid is not None:                                      # ragged edge -> drop garbage
            sq = jnp.where(valid, sq, 0.0)
        # Defer cross-lane reduction: lane-dense (1, tn) partial per row-block.
        loss_ref[0:1, :] += jnp.sum(sq, axis=0, keepdims=True)

    cost = pl.CostEstimate(
        flops=R * (2 * M * N * D + 3 * M * N),
        transcendentals=0,
        bytes_accessed=(R * M * N * t_bytes + M * D * cdt.itemsize
                        + gm * N * D * cdt.itemsize + gm * 8 * tn * 4))

    loss_parts = pl.pallas_call(
        kernel,
        out_shape=jax.ShapeDtypeStruct((gm * 8, tn), jnp.float32),
        grid=(gm, gn, R),
        in_specs=[
            pl.BlockSpec((1, 1, D), lambda i, j, r: (r, 0, 0)),
            pl.BlockSpec((tm, D), lambda i, j, r: (i, 0)),   # fetched once over the whole grid
            pl.BlockSpec((tn, D), lambda i, j, r: (j, 0)),   # re-fetched only gm times
            pl.BlockSpec((1, tm, tn), lambda i, j, r: (r, i, j)),
        ],
        out_specs=pl.BlockSpec((8, tn), lambda i, j, r: (i, 0)),
        compiler_params=pltpu.CompilerParams(
            dimension_semantics=("parallel", "arbitrary", "arbitrary"),
            vmem_limit_bytes=budget),
        cost_estimate=cost,
    )(rel, a_c, b_c, targets)
    return jnp.sum(loss_parts)


# ---------------------------------------------------------------------------------------
# Masked kernel for drug_protein: returns the exact-shape reconstruction AND the masked SSE.
# ---------------------------------------------------------------------------------------
def masked_recon_sse(a, rel_diag, b, target, mask, *, compute_dtype=jnp.float32):
    M, D = a.shape
    N = b.shape[0]
    cdt = jnp.dtype(compute_dtype)
    budget = _vmem_budget_bytes()
    stream_bytes = target.dtype.itemsize + mask.dtype.itemsize + 4   # target + mask in, f32 recon out
    tm, tn = _choose_tiles(M, N, D, stream_bytes, cdt.itemsize, budget)
    gm, gn = pl.cdiv(M, tm), pl.cdiv(N, tn)

    a_c = a.astype(compute_dtype)
    b_c = b.astype(compute_dtype)
    rel = rel_diag.astype(compute_dtype).reshape(1, D)

    row_ragged = (M % tm) != 0
    col_ragged = (N % tn) != 0

    def kernel(rel_ref, a_ref, b_ref, t_ref, m_ref, recon_ref, loss_ref):
        i, j = pl.program_id(0), pl.program_id(1)

        @pl.when(j == 0)
        def _():
            loss_ref[...] = jnp.zeros_like(loss_ref)

        ar = a_ref[...] * rel_ref[...]                             # (tm, D) VPU diag scale
        recon = jax.lax.dot_general(
            ar, b_ref[...], (((1,), (1,)), ((), ())),
            preferred_element_type=jnp.float32)
        recon_ref[...] = recon.astype(recon_ref.dtype)             # ragged-edge writes dropped
        diff = m_ref[...].astype(jnp.float32) * (recon - t_ref[...].astype(jnp.float32))
        sq = diff * diff
        valid = _edge_valid_mask(i, j, tm, tn, M, N, row_ragged, col_ragged)
        if valid is not None:
            sq = jnp.where(valid, sq, 0.0)
        loss_ref[0:1, :] += jnp.sum(sq, axis=0, keepdims=True)

    cost = pl.CostEstimate(
        flops=2 * M * N * D + 5 * M * N,
        transcendentals=0,
        bytes_accessed=(M * N * stream_bytes + M * D * cdt.itemsize
                        + gm * N * D * cdt.itemsize + gm * 8 * tn * 4))

    recon, loss_parts = pl.pallas_call(
        kernel,
        out_shape=(jax.ShapeDtypeStruct((M, N), jnp.float32),
                   jax.ShapeDtypeStruct((gm * 8, tn), jnp.float32)),
        grid=(gm, gn),
        in_specs=[
            pl.BlockSpec((1, D), lambda i, j: (0, 0)),
            pl.BlockSpec((tm, D), lambda i, j: (i, 0)),
            pl.BlockSpec((tn, D), lambda i, j: (j, 0)),
            pl.BlockSpec((tm, tn), lambda i, j: (i, j)),
            pl.BlockSpec((tm, tn), lambda i, j: (i, j)),
        ],
        out_specs=(pl.BlockSpec((tm, tn), lambda i, j: (i, j)),
                   pl.BlockSpec((8, tn), lambda i, j: (i, 0))),
        compiler_params=pltpu.CompilerParams(
            dimension_semantics=("parallel", "arbitrary"),
            vmem_limit_bytes=budget),
        cost_estimate=cost,
    )(rel, a_c, b_c, target, mask)
    return recon, jnp.sum(loss_parts)


# ---------------------------------------------------------------------------------------
# Parameters + forward
# ---------------------------------------------------------------------------------------
def init_distmult_params(dim_embedding, seed=42):
    """Reference stores th.diag(normal(0, 0.1)); only the diagonal is ever used, so we
    store the (D,) diagonal directly."""
    keys = jax.random.split(jax.random.PRNGKey(seed), 8)
    names = ["re_DDI", "re_D_ch", "re_D_Di", "re_D_Side",
             "re_D_P", "re_PPI", "re_P_seq", "re_P_Di"]
    return {n: 0.1 * jax.random.normal(k, (dim_embedding,), jnp.float32)
            for n, k in zip(names, keys)}


_EDGE_MASK_DROPS = {
    "drug": ("dd",),
    "protein": ("pp",),
    "drug,protein": ("dd", "pp"),
    "disease": ("ddi", "pdi"),
    "sideeffect": ("dse",),
    "disease,sideeffect": ("ddi", "pdi", "dse"),
    "drugsim": ("dch",),
    "proteinsim": ("pseq",),
    "drugsim,proteinsim": ("dch", "pseq"),
}


def distmult_forward(params,
                     drug_vector, disease_vector, sideeffect_vector, protein_vector,
                     drug_drug, drug_chemical, drug_disease, drug_sideeffect,
                     protein_protein, protein_sequence, protein_disease,
                     drug_protein, drug_protein_mask,
                     edge_mask=None, compute_dtype=jnp.float32):
    # TODO(synk): the reference reads a global `args.edge_mask`; it is undefined in the
    # module, so it is exposed here as an explicit kwarg (default None == no masking).
    dropped = set(_EDGE_MASK_DROPS.get(edge_mask, ()))

    terms = [
        ("dd",   drug_vector,    params["re_DDI"],    drug_vector,       drug_drug),
        ("dch",  drug_vector,    params["re_D_ch"],   drug_vector,       drug_chemical),
        ("ddi",  drug_vector,    params["re_D_Di"],   disease_vector,    drug_disease),
        ("dse",  drug_vector,    params["re_D_Side"], sideeffect_vector, drug_sideeffect),
        ("pp",   protein_vector, params["re_PPI"],    protein_vector,    protein_protein),
        ("pseq", protein_vector, params["re_P_seq"],  protein_vector,    protein_sequence),
        ("pdi",  protein_vector, params["re_P_Di"],   disease_vector,    protein_disease),
    ]

    # Group relations sharing the same (A, B) operands and target shape -> one launch each.
    groups, order = {}, []
    for name, a, r, b, t in terms:
        if name in dropped:            # masked-out loss terms are skipped entirely (loss = 0)
            continue
        key = (id(a), id(b), tuple(t.shape))
        if key not in groups:
            groups[key] = []
            order.append(key)
        groups[key].append((a, r, b, t))

    other_loss = jnp.float32(0.0)
    for key in order:
        items = groups[key]
        a, b = items[0][0], items[0][2]
        rel_stack = jnp.stack([it[1] for it in items])                 # (R, D)
        tgt_stack = jnp.stack([it[3] for it in items])                 # (R, M, N)
        other_loss = other_loss + stacked_sse_loss(
            a, rel_stack, b, tgt_stack, compute_dtype=compute_dtype)

    dp_recon, dp_loss = masked_recon_sse(
        drug_vector, params["re_D_P"], protein_vector, drug_protein, drug_protein_mask,
        compute_dtype=compute_dtype)

    tloss = dp_loss + other_loss
    return tloss, dp_recon


if __name__ == "__main__":
    dim_embedding = 32
    n_drug, n_disease, n_side, n_protein = 16, 8, 8, 24

    ks = jax.random.split(jax.random.PRNGKey(0), 13)

    drug_vector = jax.random.normal(ks[0], (n_drug, dim_embedding), jnp.float32)
    disease_vector = jax.random.normal(ks[1], (n_disease, dim_embedding), jnp.float32)
    sideeffect_vector = jax.random.normal(ks[2], (n_side, dim_embedding), jnp.float32)
    protein_vector = jax.random.normal(ks[3], (n_protein, dim_embedding), jnp.float32)

    bern = lambda k, shp: jax.random.bernoulli(k, 0.3, shp).astype(jnp.float32)
    drug_drug = bern(ks[4], (n_drug, n_drug))
    drug_chemical = jax.random.uniform(ks[5], (n_drug, n_drug), jnp.float32)
    drug_disease = bern(ks[6], (n_drug, n_disease))
    drug_sideeffect = bern(ks[7], (n_drug, n_side))
    protein_protein = bern(ks[8], (n_protein, n_protein))
    protein_sequence = jax.random.uniform(ks[9], (n_protein, n_protein), jnp.float32)
    protein_disease = bern(ks[10], (n_protein, n_disease))
    drug_protein = bern(ks[11], (n_drug, n_protein))
    drug_protein_mask = bern(ks[12], (n_drug, n_protein))

    params = init_distmult_params(dim_embedding)

    args = (params,
            drug_vector, disease_vector, sideeffect_vector, protein_vector,
            drug_drug, drug_chemical, drug_disease, drug_sideeffect,
            protein_protein, protein_sequence, protein_disease,
            drug_protein, drug_protein_mask)

    tloss, dp_recon = distmult_forward(*args)
    jax.block_until_ready((tloss, dp_recon))

    # ---- plain-JAX reference (full diag matrices, exactly like the PyTorch module) ----
    def rec(a, r_diag, b):
        return (a @ jnp.diag(r_diag)) @ b.T

    ref_losses = [
        jnp.sum((rec(drug_vector, params["re_DDI"], drug_vector) - drug_drug) ** 2),
        jnp.sum((rec(drug_vector, params["re_D_ch"], drug_vector) - drug_chemical) ** 2),
        jnp.sum((rec(drug_vector, params["re_D_Di"], disease_vector) - drug_disease) ** 2),
        jnp.sum((rec(drug_vector, params["re_D_Side"], sideeffect_vector) - drug_sideeffect) ** 2),
        jnp.sum((rec(protein_vector, params["re_PPI"], protein_vector) - protein_protein) ** 2),
        jnp.sum((rec(protein_vector, params["re_P_seq"], protein_vector) - protein_sequence) ** 2),
        jnp.sum((rec(protein_vector, params["re_P_Di"], disease_vector) - protein_disease) ** 2),
    ]
    ref_dp_recon = rec(drug_vector, params["re_D_P"], protein_vector)
    ref_dp_loss = jnp.sum((drug_protein_mask * (ref_dp_recon - drug_protein)) ** 2)
    ref_tloss = ref_dp_loss + sum(ref_losses)

    assert dp_recon.shape == (n_drug, n_protein)
    assert tloss.shape == ()
    assert jnp.allclose(dp_recon, ref_dp_recon, rtol=1e-4, atol=1e-4), "recon mismatch"
    assert jnp.allclose(tloss, ref_tloss, rtol=1e-4, atol=1e-2), "loss mismatch"

    # bf16 fast path (MXU-native on v5e/v6e/v7x): loose tolerance, exercises compute_dtype.
    tloss_bf16, dp_recon_bf16 = distmult_forward(*args, compute_dtype=jnp.bfloat16)
    jax.block_until_ready((tloss_bf16, dp_recon_bf16))
    assert jnp.allclose(dp_recon_bf16, ref_dp_recon, rtol=5e-2, atol=5e-2), "bf16 recon mismatch"
    assert jnp.allclose(tloss_bf16, ref_tloss, rtol=5e-2, atol=1.0), "bf16 loss mismatch"

    print("KERNEL_OK")
</pallas_src>

<mosaic_0001>
module attributes {stable_mosaic.version = 11 : i64} {
  func.func @kernel(%arg0: i32, %arg1: i32, %arg2: i32, %arg3: memref<1x1x32xf32, #tpu.memory_space<vmem>>, %arg4: memref<16x32xf32, #tpu.memory_space<vmem>>, %arg5: memref<128x32xf32, #tpu.memory_space<vmem>>, %arg6: memref<1x16x128xf32, #tpu.memory_space<vmem>>, %arg7: memref<8x128xf32, #tpu.memory_space<vmem>>) attributes {dimension_semantics = [#tpu.dimension_semantics<parallel>, #tpu.dimension_semantics<arbitrary>, #tpu.dimension_semantics<arbitrary>], iteration_bounds = array<i64: 1, 1, 2>, scalar_prefetch = 0 : i64, scratch_operands = 0 : i64, tpu.core_type = #tpu.core_type<tc>, window_params = [{transform_indices = @transform_0, window_bounds = array<i64: 1, 1, 32>}, {transform_indices = @transform_1, window_bounds = array<i64: 16, 32>}, {transform_indices = @transform_2, window_bounds = array<i64: 128, 32>}, {transform_indices = @transform_3, window_bounds = array<i64: 1, 16, 128>}, {transform_indices = @transform_4, window_bounds = array<i64: 8, 128>}]} {
    %c0_i32 = arith.constant 0 : i32
    %0 = arith.cmpi eq, %arg1, %c0_i32 : i32
    %c0_i32_0 = arith.constant 0 : i32
    %1 = arith.cmpi eq, %arg2, %c0_i32_0 : i32
    %2 = arith.andi %0, %1 : i1
    %3 = arith.extui %2 : i1 to i32
    %c0_i32_1 = arith.constant 0 : i32
    %4 = arith.cmpi ne, %3, %c0_i32_1 : i32
    scf.if %4 {
      %cst_17 = arith.constant 0.000000e+00 : f32
      %29 = vector.broadcast %cst_17 : f32 to vector<8x128xf32>
      %c0_18 = arith.constant 0 : index
      %c0_19 = arith.constant 0 : index
      %30 = vector.load %arg7[%c0_18, %c0_19] : memref<8x128xf32, #tpu.memory_space<vmem>>, vector<8x128xf32>
      tpu.vector_store %arg7[%c0_18, %c0_19], %29 {strides = array<i32>} : memref<8x128xf32, #tpu.memory_space<vmem>>, vector<8x128xf32>,
    } else {
    }
    %c0 = arith.constant 0 : index
    %c0_2 = arith.constant 0 : index
    %5 = vector.load %arg4[%c0, %c0_2] : memref<16x32xf32, #tpu.memory_space<vmem>>, vector<16x32xf32>
    %c0_3 = arith.constant 0 : index
    %c0_4 = arith.constant 0 : index
    %c0_5 = arith.constant 0 : index
    %6 = vector.load %arg3[%c0_3, %c0_4, %c0_5] : memref<1x1x32xf32, #tpu.memory_space<vmem>>, vector<1x1x32xf32>
    %7 = vector.shape_cast %6 : vector<1x1x32xf32> to vector<1x32xf32>
    %8 = vector.broadcast %7 : vector<1x32xf32> to vector<16x32xf32>
    %9 = arith.mulf %5, %8 : vector<16x32xf32>
    %c0_6 = arith.constant 0 : index
    %c0_7 = arith.constant 0 : index
    %10 = vector.load %arg5[%c0_6, %c0_7] : memref<128x32xf32, #tpu.memory_space<vmem>>, vector<128x32xf32>
    %cst = arith.constant dense<0.000000e+00> : vector<16x128xf32>
    %11 = tpu.matmul %9, %10, %cst {dimension_numbers = #tpu.dot_dimension_numbers<[1], [1], [0], [0], [0, 0, 1, 0], [], []>} : vector<16x32xf32>, vector<128x32xf32>, vector<16x128xf32> -> vector<16x128xf32>
    %c0_8 = arith.constant 0 : index
    %c0_9 = arith.constant 0 : index
    %c0_10 = arith.constant 0 : index
    %12 = vector.load %arg6[%c0_8, %c0_9, %c0_10] : memref<1x16x128xf32, #tpu.memory_space<vmem>>, vector<1x16x128xf32>
    %13 = vector.shape_cast %12 : vector<1x16x128xf32> to vector<16x128xf32>
    %14 = arith.subf %11, %13 : vector<16x128xf32>
    %15 = arith.mulf %14, %14 : vector<16x128xf32>
    %16 = tpu.iota {dimensions = array<i32: 1>} : vector<16x128xi32>
    %c128_i32 = arith.constant 128 : i32
    %17 = arith.muli %arg1, %c128_i32 : i32
    %18 = vector.broadcast %17 : i32 to vector<16x128xi32>
    %19 = arith.addi %16, %18 : vector<16x128xi32>
    %c16_i32 = arith.constant 16 : i32
    %20 = vector.broadcast %c16_i32 : i32 to vector<16x128xi32>
    %21 = arith.cmpi slt, %19, %20 : vector<16x128xi32>
    %cst_11 = arith.constant 0.000000e+00 : f32
    %22 = vector.broadcast %cst_11 : f32 to vector<16x128xf32>
    %23 = arith.select %21, %15, %22 : vector<16x128xi1>, vector<16x128xf32>
    %c0_12 = arith.constant 0 : index
    %c0_13 = arith.constant 0 : index
    %24 = vector.load %arg7[%c0_12, %c0_13] : memref<8x128xf32, #tpu.memory_space<vmem>>, vector<1x128xf32>
    %cst_14 = arith.constant dense<0.000000e+00> : vector<128xf32>
    %25 = vector.multi_reduction <add>, %23, %cst_14 [0] : vector<16x128xf32> to vector<128xf32>
    %26 = vector.shape_cast %25 : vector<128xf32> to vector<1x128xf32>
    %27 = arith.addf %24, %26 : vector<1x128xf32>
    %c0_15 = arith.constant 0 : index
    %c0_16 = arith.constant 0 : index
    %28 = vector.load %arg7[%c0_15, %c0_16] : memref<8x128xf32, #tpu.memory_space<vmem>>, vector<1x128xf32>
    tpu.vector_store %arg7[%c0_15, %c0_16], %27 {strides = array<i32>} : memref<8x128xf32, #tpu.memory_space<vmem>>, vector<1x128xf32>,
    return
  }
  func.func @transform_0(%arg0: i32, %arg1: i32, %arg2: i32) -> (i32, i32, i32) {
    %c0_i32 = arith.constant 0 : i32
    %c0_i32_0 = arith.constant 0 : i32
    %c0_i32_1 = arith.constant 0 : i32
    return %arg2, %c0_i32, %c0_i32_0 : i32, i32, i32
  }
  func.func @transform_1(%arg0: i32, %arg1: i32, %arg2: i32) -> (i32, i32) {
    %c0_i32 = arith.constant 0 : i32
    %c0_i32_0 = arith.constant 0 : i32
    return %arg0, %c0_i32 : i32, i32
  }
  func.func @transform_2(%arg0: i32, %arg1: i32, %arg2: i32) -> (i32, i32) {
    %c0_i32 = arith.constant 0 : i32
    %c0_i32_0 = arith.constant 0 : i32
    return %arg1, %c0_i32 : i32, i32
  }
  func.func @transform_3(%arg0: i32, %arg1: i32, %arg2: i32) -> (i32, i32, i32) {
    %c0_i32 = arith.constant 0 : i32
    return %arg2, %arg0, %arg1 : i32, i32, i32
  }
  func.func @transform_4(%arg0: i32, %arg1: i32, %arg2: i32) -> (i32, i32) {
    %c0_i32 = arith.constant 0 : i32
    %c0_i32_0 = arith.constant 0 : i32
    return %arg0, %c0_i32 : i32, i32
  }
}

</mosaic_0001>

<bundles_post_ra>
// kernel: tpu_custom_call.1
= control target key start
LH: loop header
LB: loop body
LE: loop exit
PB: predicated region body
PF: predicated region fallthrough
CT: control target
= control target key end

     0   :  { %9 = vsyncpa [#allocation3], 0  ;;  %s1376_s0 = inlined_call_operand.hbm [shape: f32[2,1,32], index: 0, kind: input, shape index: {}]   ;;  %s1377_s1 = inlined_call_operand.hbm [shape: f32[16,32], index: 1, kind: input, shape index: {}]   ;;  %s1378_s2 = inlined_call_operand.hbm [shape: f32[16,32], index: 2, kind: input, shape index: {}]   ;;  %s1379_s3 = inlined_call_operand.hbm [shape: f32[2,16,16], index: 3, kind: input, shape index: {}]   ;;  %s1380_s4 = inlined_call_operand.hbm [shape: f32[8,128], index: 4, kind: output, shape index: {}]  }
   0x1   :  { %11 = vsyncpa [#allocation3 + $0x1], 0 }
   0x2   :  { %12 = vsyncpa [#allocation6], 0 }
   0x3   :  { %13 = vsyncpa [#allocation9], 0 }
   0x4   :  { %15 = vsyncpa [#allocation9 + $0x1], 0 }
   0x5   :  { %16 = vsyncpa [#allocation4], 0  ;;  %s1091_s15 = smov 0   ;;  %s1093_s16 = smov 0  }
   0x6   :  { %s1095_s17 = smov 0   ;;  %s1097_s18 = smov 0  }
   0x7   :  { %s1099_s19 = smov 0   ;;  %s1101_s20 = smov 0  }
   0x8 LB: > { %s1120_s21 = sadd.s32 4294967295, %s1052_s20   ;;  %s34_s22 = sadd.s32 1, %s1048_s19  ;;  %s1052_s20 = sphi %s1101_s20, %s22_s20   ;;  %s1048_s19 = sphi %s1099_s19, %s1396_s19   ;;  %s1044_s18 = sphi %s1097_s18, %s1395_s18   ;;  %s1040_s17 = sphi %s1095_s17, %s1394_s17   ;;  %s1036_s16 = sphi %s1093_s16, %s1393_s16   ;;  %s1032_s15 = sphi %s1091_s15, %s1392_s15  }
   0x9   : > { %p35_p0 = scmp.ge.s32.totalorder %s34_s22, 2  ;;  %s48_s23 = sadd.s32 1, %s1040_s17 }
   0xa   : > { %p55_p1 = scmp.ne.s32.totalorder %s1040_s17, %s1036_s16  ;;  %p56_p2 = scmp.eq.s32.totalorder %s1052_s20, 0 }
   0xb   : > { %s1398_s22 = smov (%p35_p0, %s34_s22), 0  ;;  %p61_p4 = scmp.ne.s32.totalorder %s1036_s16, %s1032_s15 }
   0xc   : > { %p1129_p3 = por %p56_p2, %p55_p1  ;;  %s45_s25 = ssub.s32 %s1048_s19, %s1398_s22 }
   0xd   : > { %p62_p5 = scmp.eq.s32.totalorder %s1120_s21, 0  ;;  %p46_p6 = scmp.eq.s32.totalorder %s45_s25, 0 }
   0xe   : > { %p632_p7 = scmp.ge.s32.totalorder %s1052_s20, 1  ;;  %p180_p9 = scmp.lt.s32.totalorder %s1052_s20, 3 }
   0xf   : > { %p1140_p8 = por %p62_p5, %p61_p4 }
  0x10   : > { %s1146_s27 = scalar_select %p46_p6, %s1040_s17, %s48_s23  }
  0x11   : > { %s1384_s26 = scalar_select %p1140_p8, 1, 0 }
  0x12   : > { %p1148_p10 = pnand %p632_p7, %p180_p9 }
  0x13   : > { %s1054_s29 = smov (!%p1148_p10), [#allocation5]   ;;  %s856_s7 = scalar_lea.hbm (!%p1148_p10), %s1377_s1, 256 }
  0x14   : > { %s1385_s28 = scalar_select %p1148_p10, 1, 0 }
  0x15   : > { %184 = sbr.rel (%p1148_p10) target bundleno = 70 (0x46), region = 12  ;;  %s195_s30 = sshll.u32 (!%p1148_p10), %s1054_s29, 4  ;;  %s196_s30 = int_to_ptr.vmem [resolvable:$true] %s195_s30 }
  0x16   : > { %p857_p12 = scmp.ne.s32.totalorder (!%p1148_p10), %s1377_s1, %s856_s7  ;;  %p862_p1 = scmp.lt.u32.totalorder (!%p1148_p10), %s856_s7, %s1377_s1 }
  0x18   : > { %p858_p13 = pnand (!%p1148_p10), %p857_p12, %p62_p5 }
  0x1a   : > { %p859_p0 = pneg (!%p1148_p10), %p858_p13 }
  0x1c   : > { %p864_p2 = pnand %p862_p1, %p859_p0 }
  0x1e   : > { %867 = shalt.err (!%p864_p2)
}
  0x1f   : > { %s868_s12 = scalar_lea.vmem %s196_s30, 256  ;;  %p875_p9 = scmp.lt.s32.totalorder %s196_s30, %s196_s30 }
  0x20   : > { %p869_p4 = scmp.ne.s32.totalorder %s196_s30, %s868_s12  ;;  %p876_p11 = scmp.lt.s32.totalorder %s868_s12, %s868_s12 }
  0x22   : > { %p870_p6 = pnand %p869_p4, %p62_p5  ;;  %p877_p8 = por %p876_p11, %p875_p9 }
  0x24   : > { %p871_p7 = pneg %p870_p6 }
  0x26   : > { %p878_p10 = pnand %p877_p8, %p871_p7 }
  0x28   : > { %881 = shalt.err (!%p878_p10)
}
  0x29   : > { %s1055_s13 = smov 128   ;;  %s1056_s14 = smov 8  }
  0x2a   : > { %772 = dma.hbm_to_vmem [thread:$0]  (%p62_p5), %s1377_s1, 256, %s196_s30, [#allocation6], %s1055_s13, %s1055_s13, %s1056_s14  }
  0x2b   : > { %p1386_p12 = scmp.ne.s32.totalorder %s1120_s21, 0 }
  0x2d   : > { %204 = sbr.rel (%p1386_p12) target bundleno = 70 (0x46), region = 20 }
  0x34   : > { %210 = vsyncadd [#allocation6], 1792  ;;  %s1057_s25 = smov [#allocation7]   ;;  %s882_s7 = scalar_lea.hbm %s1378_s2, 256 }
  0x35   : > { %s215_s29 = sshll.u32 %s1057_s25, 4  ;;  %p883_p8 = scmp.ne.s32.totalorder %s1378_s2, %s882_s7  ;;  %s216_s29 = int_to_ptr.vmem [resolvable:$true] %s215_s29 }
  0x36   : > { %p886_p10 = scmp.lt.u32.totalorder %s882_s7, %s1378_s2 }
  0x38   : > { %p888_p11 = pnand %p886_p10, %p883_p8 }
  0x3a   : > { %891 = shalt.err (!%p888_p11)
}
  0x3b   : > { %s892_s30 = scalar_lea.vmem %s216_s29, 256  ;;  %s896_s12 = scalar_lea.vmem %s216_s29, 2048 }
  0x3c   : > { %p893_p13 = scmp.ne.s32.totalorder %s216_s29, %s892_s30  ;;  %p897_p0 = scmp.lt.s32.totalorder %s216_s29, %s216_s29 }
  0x3d   : > { %p898_p1 = scmp.lt.s32.totalorder %s896_s12, %s892_s30 }
  0x3f   : > { %p899_p2 = por %p898_p1, %p897_p0 }
  0x41   : > { %p900_p4 = pnand %p899_p2, %p893_p13 }
  0x43   : > { %903 = shalt.err (!%p900_p4)
}
  0x44   : > { %s1058_s13 = smov 128   ;;  %s1059_s14 = smov 8  }
  0x45   : > { %221 = dma.hbm_to_vmem [thread:$0]  %s1378_s2, 256, %s216_s29, [#allocation6], %s1058_s13, %s1058_s13, %s1059_s14  }
  0x46 PF: > { %p793_p6 = scmp.lt.s32.totalorder %s1052_s20, 2  ;;  %s1189_s25 = sand.u32 1, %s1040_s17  }
  0x47   : > { %s636_s5 = sshll.u32 %s1048_s19, 4  ;;  %s232_s29 = scalar_lea.vmem [#allocation2], %s1189_s25 }
  0x48   : > { %s1195_s8 = scalar_lea.hbm %s1376_s0, %s636_s5  ;;  %s239_s9 = sshll.u32 %s232_s29, 4  ;;  %s1198_s9 = int_to_ptr.vmem [resolvable:$true] %s239_s9 }
  0x49   : > { %p1202_p7 = pnand %p793_p6, %p1129_p3  ;;  %s637_s11 = sshll.u32 %s1189_s25, 4 }
  0x4a   : > { %s230_s30 = scalar_lea.sflag [#allocation3], %s1189_s25  ;;  %s904_s12 = scalar_lea.hbm %s1195_s8, 16 }
  0x4b   : > { %p905_p9 = scmp.ne.s32.totalorder %s1195_s8, %s904_s12  ;;  %p906_p12 = pneg %p1202_p7 }
  0x4c   : > { %s909_s24 = scalar_lea.hbm %s1376_s0, 32  ;;  %p910_p3 = scmp.lt.u32.totalorder %s1195_s8, %s1376_s0 }
  0x4d   : > { %p907_p8 = pnand %p906_p12, %p905_p9  ;;  %p911_p11 = scmp.lt.u32.totalorder %s909_s24, %s904_s12 }
  0x4e   : > { %p913_p0 = scmp.lt.u32.totalorder %s904_s12, %s1195_s8 }
  0x4f   : > { %p908_p10 = pneg %p907_p8  ;;  %p912_p13 = por %p911_p11, %p910_p3 }
  0x51   : > { %p914_p1 = por %p913_p0, %p912_p13 }
  0x53   : > { %p915_p2 = pnand %p914_p1, %p908_p10 }
  0x55   : > { %918 = shalt.err (!%p915_p2)
}
  0x56   : > { %s919_s5 = scalar_lea.vmem %s1198_s9, 16  ;;  %s1060_s6 = smov [#allocation2]  }
  0x57   : > { %p920_p4 = scmp.ne.s32.totalorder %s1198_s9, %s919_s5  ;;  %s924_s7 = sshll.u32 %s1060_s6, 4  ;;  %s925_s7 = int_to_ptr.vmem [resolvable:$false] %s924_s7 }
  0x58   : > { %s926_s29 = scalar_lea.vmem %s925_s7, 32  ;;  %p927_p8 = scmp.lt.s32.totalorder %s1198_s9, %s925_s7 }
  0x59   : > { %p922_p6 = pnand %p920_p4, %p906_p12  ;;  %p928_p3 = scmp.lt.s32.totalorder %s926_s29, %s919_s5 }
  0x5b   : > { %p923_p9 = pneg %p922_p6  ;;  %p929_p11 = por %p928_p3, %p927_p8 }
  0x5d   : > { %p930_p13 = pnand %p929_p11, %p923_p9 }
  0x5f   : > { %933 = shalt.err (!%p930_p13)
}
  0x60   : > { %788 = dma.hbm_to_vmem [thread:$0]  (!%p1202_p7), %s1195_s8, 16, %s1198_s9, %s230_s30  }
  0x61   : > { %s668_s12 = sshll.u32 %s1048_s19, 8  ;;  %s250_s13 = scalar_lea.vmem [#allocation8], %s637_s11 }
  0x62   : > { %s260_s14 = sshll.u32 %s250_s13, 4  ;;  %s1239_s23 = scalar_lea.hbm %s1379_s3, %s668_s12  ;;  %s1241_s14 = int_to_ptr.vmem [resolvable:$true] %s260_s14 }
  0x63   : > { %s247_s5 = scalar_lea.sflag [#allocation9], %s1189_s25  ;;  %s934_s6 = scalar_lea.hbm %s1239_s23, 256 }
  0x64   : > { %p935_p10 = scmp.ne.s32.totalorder %s1239_s23, %s934_s6  ;;  %s939_s11 = scalar_lea.hbm %s1379_s3, 512 }
  0x65   : > { %p940_p2 = scmp.lt.u32.totalorder %s1239_s23, %s1379_s3  ;;  %p941_p4 = scmp.lt.u32.totalorder %s939_s11, %s934_s6 }
  0x66   : > { %p937_p0 = pnand %p935_p10, %p906_p12  ;;  %p943_p9 = scmp.lt.u32.totalorder %s934_s6, %s1239_s23 }
  0x67   : > { %p942_p6 = por %p941_p4, %p940_p2 }
  0x68   : > { %p938_p1 = pneg %p937_p0 }
  0x69   : > { %p944_p8 = por %p943_p9, %p942_p6 }
  0x6b   : > { %p945_p3 = pnand %p944_p8, %p938_p1 }
  0x6d   : > { %948 = shalt.err (!%p945_p3)
}
  0x6e   : > { %s949_s29 = scalar_lea.vmem %s1241_s14, 256  ;;  %s1061_s12 = smov [#allocation8]  }
  0x6f   : > { %p950_p11 = scmp.ne.s32.totalorder %s1241_s14, %s949_s29  ;;  %s954_s13 = sshll.u32 %s1061_s12, 4  ;;  %s955_s13 = int_to_ptr.vmem [resolvable:$false] %s954_s13 }
  0x70   : > { %s956_s24 = scalar_lea.vmem %s955_s13, 512  ;;  %p957_p0 = scmp.lt.s32.totalorder %s1241_s14, %s955_s13 }
  0x71   : > { %p952_p13 = pnand %p950_p11, %p906_p12  ;;  %p958_p2 = scmp.lt.s32.totalorder %s956_s24, %s949_s29 }
  0x73   : > { %p953_p10 = pneg %p952_p13  ;;  %p959_p4 = por %p958_p2, %p957_p0 }
  0x75   : > { %p960_p6 = pnand %p959_p4, %p953_p10 }
  0x77   : > { %963 = shalt.err (!%p960_p6)
}
  0x78   : > { %s1062_s15 = smov 128   ;;  %s1063_s6 = smov 8  }
  0x79   : > { %791 = dma.hbm_to_vmem [thread:$0]  (!%p1202_p7), %s1239_s23, 256, %s1241_s14, %s247_s5, %s1062_s15, %s1062_s15, %s1063_s6  }
  0x7a   : > { %p1388_p12 = scmp.ne.s32.totalorder %s1385_s28, 0 }
  0x7b   : > { %s1272_s8 = sand.u32 (!%p1388_p12), 1, %s1036_s16   ;;  %p1389_p1 = scmp.ne.s32.totalorder (!%p1388_p12), %s1384_s26, 0 }
  0x7c   : > { %272 = sbr.rel (%p1388_p12) target bundleno = 462 (0x1ce), region = 36  ;;  %s275_s9 = scalar_lea.sflag (!%p1388_p12), [#allocation3], %s1272_s8 }
  0x7d   : > { %s277_s11 = scalar_lea.vmem (!%p1388_p12), [#allocation2], %s1272_s8 }
  0x83   : > { %1015 = dma.done.wait (%p1389_p1), %s275_s9, 16  }
  0x84   : > { %1017 = vsyncadd (%p1389_p1), %s275_s9, 4294967280 }
  0x85   : > { %1019 = dma.done.wait (%p62_p5), [#allocation6], 2304  }
  0x86   : > { %1021 = vsyncadd (%p62_p5), [#allocation6], 4294964992  ;;  %s643_s28 = sshll.u32 %s1272_s8, 4  ;;  %s291_s25 = scalar_lea.sflag [#allocation9], %s1272_s8 }
  0x87   : > { %s1286_s10 = scalar_lea.vmem [#allocation8], %s643_s28 }
  0x88   : > { %1023 = dma.done.wait (%p1389_p1), %s291_s25, 256  }
  0x89   : > { %1025 = vsyncadd (%p1389_p1), %s291_s25, 4294967040  ;;  %p324_p7 = scmp.eq.s32.totalorder %s1044_s18, 0 }
  0x8a   : > { %v1064_v0 = vmov (%p324_p7), 0.0  }
  0x8b   : > { %328 = sbr.rel (!%p324_p7) target bundleno = 146 (0x92), region = 56  ;;  %329 = vst [vmem:[#allocation10] sm:$0xff] (%p324_p7), %v1064_v0 }
  0x92 PF: > { %v341_v1 = vld [vmem:[#allocation7] sm:$0xff]  ;;  %v342_v2 = vld [vmem:[#allocation7 + $0x8] sm:$0xff]  ;;  %vm357_vm0 = vcmask 261120   ;;  %v343_v3 = vld [vmem:[#allocation7 + $0x10] sm:$0xff]  ;;  %v493_v31 = vlaneseq  ;;  %s1065_s18 = smov [#allocation10]   ;;  %p796_p5 = scmp.eq.s32.totalorder %s1120_s21, 1 }
  0x93   : > { %v723_v4 = vpack.c.bf16 %v342_v2, %v341_v1  ;;  %vm1295_vm1 = vmpackc.low %vm357_vm0, %vm357_vm0  ;;  %v344_v6 = vld [vmem:[#allocation7 + $0x18] sm:$0xff]  ;;  %v330_v8 = vld [vmem:[#allocation5] sm:$0xff]  ;;  %s520_s26 = sshll.u32 %s1065_s18, 4  ;;  %s521_s26 = int_to_ptr.vmem [resolvable:$true] %s520_s26 }
  0x94   : > { %v729_v7 = vpack.c.bf16 %v344_v6, %v343_v3  ;;  %v345_v9 = vld [vmem:[#allocation7 + $0x20] sm:$0xff]  ;;  %v346_v10 = vld [vmem:[#allocation7 + $0x28] sm:$0xff]  ;;  %v347_v14 = vld [vmem:[#allocation7 + $0x30] sm:$0xff]  ;;  %v494_v33 = vand.u32 127, %v493_v31  ;;  %s964_s14 = scalar_lea.vmem %s521_s26, 128  ;;  %p971_p11 = scmp.lt.s32.totalorder %s521_s26, %s521_s26 }
  0x95   : > { %725 = vmatprep.subr.msk.bf16.mxu0 %vm1295_vm1, %v723_v4  ;;  %v645_v11 = vld [vmem:[%s277_s11] ss:$0 sm:$0xff]  ;;  %v735_v13 = vpack.c.bf16 %v346_v10, %v345_v9  ;;  %v348_v15 = vld [vmem:[#allocation7 + $0x38] sm:$0xff]  ;;  %v349_v17 = vld [vmem:[#allocation7 + $0x40] sm:$0xff]  ;;  %p965_p9 = scmp.ne.s32.totalorder %s521_s26, %s964_s14  ;;  %p972_p13 = scmp.lt.s32.totalorder %s964_s14, %s964_s14 }
  0x96   : > { %728 = vmatpush3.bf16.xpose.msk.msra.mxu0 %vm1295_vm1, %v723_v4  ;;  %v339_v12 = vmul.f32 %v645_v11, %v330_v8  ;;  %v741_v16 = vpack.c.bf16 %v348_v15, %v347_v14  ;;  %v350_v18 = vld [vmem:[#allocation7 + $0x48] sm:$0xff]  ;;  %v351_v20 = vld [vmem:[#allocation7 + $0x50] sm:$0xff]  ;;  %v352_v21 = vld [vmem:[#allocation7 + $0x58] sm:$0xff]  ;;  %vm498_vm2 = vcmp.lt.s32.totalorder %v494_v33, 16 }
  0x97   : > { %731 = vmatprep.subr.msk.bf16.mxu0 %vm1295_vm1, %v729_v7  ;;  %v747_v19 = vpack.c.bf16 %v350_v18, %v349_v17  ;;  %v753_v22 = vpack.c.bf16 %v352_v21, %v351_v20  ;;  %v353_v23 = vld [vmem:[#allocation7 + $0x60] sm:$0xff]  ;;  %v354_v24 = vld [vmem:[#allocation7 + $0x68] sm:$0xff]  ;;  %v355_v26 = vld [vmem:[#allocation7 + $0x70] sm:$0xff]  ;;  %p966_p8 = pnand %p965_p9, %p796_p5  ;;  %p973_p10 = por %p972_p13, %p971_p11 }
  0x98   : > { %720 = vmatprep.mubr.msk.f32.mxu0 %vm357_vm0, %v339_v12  ;;  %v759_v25 = vpack.c.bf16 %v354_v24, %v353_v23  ;;  %v356_v27 = vld [vmem:[#allocation7 + $0x78] sm:$0xff]  ;;  %v487_v34 = vld [vmem:[%s1286_s10] sm:$0xff] }
  0x99   : > { %v765_v28 = vpack.c.bf16 %v356_v27, %v355_v26  ;;  %v331_v29 = vld [vmem:[#allocation5 + $0x8] sm:$0xff]  ;;  %v501_v49 = vld [vmem:[#allocation10] sm:$0x1]  ;;  %p967_p3 = pneg %p966_p8 }
  0x9a   : > { %v340_v30 = vmul.f32 %v645_v11, %v331_v29  ;;  %v488_v32 = vld [vmem:[%s1286_s10 + $0x8] sm:$0xff] }
  0x9b   : > { %p974_p0 = pnand %p973_p10, %p967_p3 }
  0x9e   : > { %734 = vmatpush3.bf16.xpose.msk.msra.mxu0 %vm1295_vm1, %v729_v7 }
  0x9f   : > { %737 = vmatprep.subr.msk.bf16.mxu0 %vm1295_vm1, %v735_v13 }
  0xa6   : > { %740 = vmatpush3.bf16.xpose.msk.msra.mxu0 %vm1295_vm1, %v735_v13 }
  0xa7   : > { %743 = vmatprep.subr.msk.bf16.mxu0 %vm1295_vm1, %v741_v16 }
  0xae   : > { %746 = vmatpush3.bf16.xpose.msk.msra.mxu0 %vm1295_vm1, %v741_v16 }
  0xaf   : > { %749 = vmatprep.subr.msk.bf16.mxu0 %vm1295_vm1, %v747_v19 }
  0xb6   : > { %752 = vmatpush3.bf16.xpose.msk.msra.mxu0 %vm1295_vm1, %v747_v19 }
  0xb7   : > { %755 = vmatprep.subr.msk.bf16.mxu0 %vm1295_vm1, %v753_v22 }
  0xbe   : > { %758 = vmatpush3.bf16.xpose.msk.msra.mxu0 %vm1295_vm1, %v753_v22 }
  0xbf   : > { %761 = vmatprep.subr.msk.bf16.mxu0 %vm1295_vm1, %v759_v25 }
  0xc6   : > { %764 = vmatpush3.bf16.xpose.msk.msra.mxu0 %vm1295_vm1, %v759_v25 }
  0xc7   : > { %767 = vmatprep.subr.msk.bf16.mxu0 %vm1295_vm1, %v765_v28 }
  0xce   : > { %770 = vmatpush3.bf16.xpose.msk.msra.mxu0 %vm1295_vm1, %v765_v28 }
  0xd5   : > { %721 = vmatmul.mubr.msk.f32.vlgmr.msra.gmra.mrb[0].mxu0 %vm357_vm0, %v340_v30 }
 0x1a8   : > { %v722_v35 = vpop.f32.mrb[0].mxu0 }
 0x1a9   : > { %v490_v36 = vsub.f32 %v722_v35, %v488_v32  ;;  %v478_v37 = vpop.f32.mrb[1].mxu0 }
 0x1aa   : > { %v489_v38 = vsub.f32 %v478_v37, %v487_v34 }
 0x1ab   : > { %v492_v39 = vmul.f32 %v490_v36, %v490_v36 }
 0x1ac   : > { %v491_v40 = vmul.f32 %v489_v38, %v489_v38 }
 0x1ad   : > { %v500_v41 = vsel %vm498_vm2, %v492_v39, 0.0 }
 0x1ae   : > { %v499_v42 = vsel %vm498_vm2, %v491_v40, 0.0 }
 0x1af   : > { %v502_v43 = vadd.f32 %v500_v41, %v499_v42 }
 0x1b1   : > { %v503_v44 = vrot.slane %v502_v43, 4 }
 0x1b3   : > { %v504_v45 = vadd.f32 %v503_v44, %v502_v43 }
 0x1b5   : > { %v505_v46 = vrot.slane %v504_v45, 2 }
 0x1b7   : > { %v506_v47 = vadd.f32 %v505_v46, %v504_v45 }
 0x1b9   : > { %v507_v48 = vrot.slane %v506_v47, 1 }
 0x1bb   : > { %v508_v50 = vadd.f32 %v507_v48, %v506_v47 }
 0x1bd   : > { %v509_v51 = vadd.f32 %v508_v50, %v501_v49 }
 0x1bf   : > { %510 = vst [vmem:[#allocation10] sm:$0x1] %v509_v51 }
 0x1c0   : > { %977 = shalt.err (!%p974_p0)
}
 0x1c1   : > { %s978_s30 = scalar_lea.hbm %s1380_s4, 128 }
 0x1c2   : > { %p979_p2 = scmp.ne.s32.totalorder %s1380_s4, %s978_s30  ;;  %p984_p12 = scmp.lt.u32.totalorder %s978_s30, %s1380_s4 }
 0x1c4   : > { %p980_p4 = pnand %p979_p2, %p796_p5 }
 0x1c6   : > { %p981_p6 = pneg %p980_p4 }
 0x1c8   : > { %p986_p1 = pnand %p984_p12, %p981_p6 }
 0x1ca   : > { %989 = shalt.err (!%p986_p1)
}
 0x1cb   : > { %782 = dma.vmem_to_hbm [thread:$0]  (%p796_p5), %s521_s26, 128, %s1380_s4, [#allocation4]  }
 0x1cc   : > { %1027 = dma.done.wait (%p796_p5), [#allocation4], 128  }
 0x1cd   : > { %1029 = vsyncadd (%p796_p5), [#allocation4], 4294967168 }
 0x1ce PF: > { %s22_s20 = sadd.s32 1, %s1052_s20   ;;  %s1392_s15 = smov %s1036_s16 }
 0x1cf   : > { %p19_p7 = scmp.ge.s32.totalorder %s22_s20, 4   ;;  %s1393_s16 = smov %s1040_s17 }
 0x1d0   : > { %s1394_s17 = smov %s1146_s27  ;;  %s1395_s18 = smov %s1048_s19 }
 0x1d1   : > { %s1396_s19 = smov %s1398_s22  ;;  %21 = sbr.rel (!%p19_p7) target bundleno = 8 (0x8), region = 101 }
 0x1d8   :  { %533 = vsyncpa [#allocation3], 1 }
 0x1d9   :  { %535 = vsyncpa [#allocation3 + $0x1], 1 }
 0x1da   :  { %536 = vsyncpa [#allocation6], 1 }
 0x1db   :  { %537 = vsyncpa [#allocation9], 1 }
 0x1dc   :  { %539 = vsyncpa [#allocation9 + $0x1], 1 }
 0x1dd   :  { %540 = vsyncpa [#allocation4], 1 }
 0x1de   :  { %542 = vsyncpa [#allocation4 + $0x1], 1 }

</bundles_post_ra>
